<compile_context>
chip_gen: v7x
topology: tpu7x:2x2x1
jax: 0.10.0
libtpu: 0.0.40
codegen_flags: <defaults>
</compile_context>

<pallas_src>
import jax
import jax.numpy as jnp
from jax.experimental import pallas as pl
from jax.experimental.pallas import tpu as pltpu


_LAYER_SIZES = [(4, 256), (256, 128), (128, 64), (64, 32), (32, 3)]


def _round_up(x, m):
    return ((x + m - 1) // m) * m


def iris_mlp_kernel(xT_ref,
                    w1_ref, b1_ref,
                    w2_ref, b2_ref,
                    w3_ref, b3_ref,
                    w4_ref, b4_ref,
                    w5_ref, b5_ref,
                    out_ref):
    # xT_ref: (4, TILE) f32, batch on the 128-wide lane axis.
    # w_i: (out_i, in_i) bf16 (torch layout).  b_i: (out_i, 1) f32.
    # out_ref: (8, TILE) f32 -- rows 3..7 are zero padding of the class dim.

    def layer(w_ref, b_ref, h, relu):
        # bf16 x bf16 -> f32 accumulate on the MXU; bias + ReLU stay in f32.
        acc = jnp.dot(w_ref[...], h.astype(jnp.bfloat16),
                      preferred_element_type=jnp.float32) + b_ref[...]
        return jnp.maximum(acc, 0.0) if relu else acc

    h = xT_ref[...]
    h = layer(w1_ref, b1_ref, h, True)
    # dropout(p=0.5): identity at inference time (module.eval() semantics).
    h = layer(w2_ref, b2_ref, h, True)
    h = layer(w3_ref, b3_ref, h, True)
    h = layer(w4_ref, b4_ref, h, True)
    out_ref[...] = layer(w5_ref, b5_ref, h, False).astype(out_ref.dtype)


def _choose_tiling(n, tile_n):
    """Pick (tile, steps): tile a multiple of 128; for n > 128 force an even number of
    >= 2 grid steps so v7x's second TensorCore gets work (harmless on v5e/v6e)."""
    tile_cap = max(128, _round_up(tile_n, 128))
    steps = max(1, pl.cdiv(n, tile_cap))
    if n > 128 and steps % 2 == 1:
        steps += 1
    tile = _round_up(pl.cdiv(n, steps), 128)
    return tile, steps


def iris_forward(x, params, *, tile_n=4096):
    """x: (N, 4) float32.  params: list of (W, b), W torch-layout (out, in), b (out, 1)."""
    n, f = x.shape
    n_classes = params[-1][0].shape[0]
    out_rows = _round_up(n_classes, 8)          # pad class dim 3 -> 8: full-sublane stores

    tile, steps = _choose_tiling(n, tile_n)
    n_pad = tile * steps

    # Feature-major, zero-padded batch.  Padded columns only carry relu(bias) values and are
    # sliced off below; they never touch real outputs.
    xT = jnp.pad(x.T, ((0, 0), (0, n_pad - n)))

    flat = []
    in_specs = [pl.BlockSpec((f, tile), lambda i: (0, i))]
    for layer_idx, (w, b) in enumerate(params):
        w = w.astype(jnp.bfloat16)              # bf16 MXU operands
        b = b.astype(jnp.float32)
        if layer_idx == len(params) - 1 and out_rows != n_classes:
            w = jnp.pad(w, ((0, out_rows - n_classes), (0, 0)))
            b = jnp.pad(b, ((0, out_rows - n_classes), (0, 0)))
        flat.extend([w, b])
        # Resident full-array weight/bias blocks: constant index_map -> no re-DMA per step.
        in_specs.append(pl.BlockSpec(w.shape, lambda i: (0, 0)))
        in_specs.append(pl.BlockSpec(b.shape, lambda i: (0, 0)))

    out_t = pl.pallas_call(
        iris_mlp_kernel,
        out_shape=jax.ShapeDtypeStruct((out_rows, n_pad), jnp.float32),
        grid=(steps,),
        in_specs=in_specs,
        out_specs=pl.BlockSpec((out_rows, tile), lambda i: (0, i)),
        compiler_params=pltpu.CompilerParams(
            # Batch tiles are independent -> v7x 2-TC sharding; no-op on v5e/v6e.
            dimension_semantics=("parallel",),
            # Covers v5e's 16 MiB scoped default; well under v7x's 64 MiB physical VMEM.
            vmem_limit_bytes=32 * 1024 * 1024),
    )(xT, *flat)

    # Back to (N, n_classes) row-major, dropping class-dim and batch padding.
    return out_t[:n_classes, :n].T


def init_params(key):
    """Matches PyTorch nn.Linear default init: W, b ~ U(-1/sqrt(fan_in), 1/sqrt(fan_in)).
    W stored torch-layout (out, in); b stored as an (out, 1) column (feature-major)."""
    params = []
    for fan_in, fan_out in _LAYER_SIZES:
        key, kw, kb = jax.random.split(key, 3)
        bound = 1.0 / (fan_in ** 0.5)
        w = jax.random.uniform(kw, (fan_out, fan_in), jnp.float32, -bound, bound)
        b = jax.random.uniform(kb, (fan_out, 1), jnp.float32, -bound, bound)
        params.append((w, b))
    return params


def reference_forward_bf16(x, params):
    """Mirrors the kernel numerics: bf16 matmul operands, f32 accumulation, f32 bias/ReLU."""
    h = x
    for i, (w, b) in enumerate(params):
        h = jnp.dot(h.astype(jnp.bfloat16), w.astype(jnp.bfloat16).T,
                    preferred_element_type=jnp.float32) + b.T
        if i < len(params) - 1:
            h = jnp.maximum(h, 0.0)
    return h


def reference_forward_f32(x, params):
    h = x
    for i, (w, b) in enumerate(params):
        h = h @ w.T + b.T
        if i < len(params) - 1:
            h = jnp.maximum(h, 0.0)
    return h


if __name__ == "__main__":
    key = jax.random.PRNGKey(0)
    key, k_small, k_ragged, k_large = jax.random.split(key, 4)
    params = init_params(key)

    cases = [
        ("small", jax.random.normal(k_small, (8, 4), dtype=jnp.float32)),      # single tile
        ("ragged", jax.random.normal(k_ragged, (1000, 4), dtype=jnp.float32)),  # padding path
        ("large", jax.random.normal(k_large, (4096, 4), dtype=jnp.float32)),    # multi-tile grid
    ]
    for name, x in cases:
        out = jax.block_until_ready(iris_forward(x, params))
        assert out.shape == (x.shape[0], 3), f"bad output shape for {name}: {out.shape}"
        # Tight check against a reference with matching bf16-operand numerics.
        ref_bf16 = reference_forward_bf16(x, params)
        assert jnp.allclose(out, ref_bf16, atol=2e-3, rtol=2e-3), f"mismatch vs bf16 ref ({name})"
        # Loose sanity check against the pure-f32 reference (bf16 rounding tolerance).
        ref_f32 = reference_forward_f32(x, params)
        assert jnp.allclose(out, ref_f32, atol=1e-1, rtol=1e-1), f"mismatch vs f32 ref ({name})"

    print("KERNEL_OK")
</pallas_src>

<mosaic_0001>
module attributes {stable_mosaic.version = 11 : i64} {
  func.func @iris_mlp_kernel(%arg0: i32, %arg1: memref<4x128xf32, #tpu.memory_space<vmem>>, %arg2: memref<256x4xbf16, #tpu.memory_space<vmem>>, %arg3: memref<256x1xf32, #tpu.memory_space<vmem>>, %arg4: memref<128x256xbf16, #tpu.memory_space<vmem>>, %arg5: memref<128x1xf32, #tpu.memory_space<vmem>>, %arg6: memref<64x128xbf16, #tpu.memory_space<vmem>>, %arg7: memref<64x1xf32, #tpu.memory_space<vmem>>, %arg8: memref<32x64xbf16, #tpu.memory_space<vmem>>, %arg9: memref<32x1xf32, #tpu.memory_space<vmem>>, %arg10: memref<8x32xbf16, #tpu.memory_space<vmem>>, %arg11: memref<8x1xf32, #tpu.memory_space<vmem>>, %arg12: memref<8x128xf32, #tpu.memory_space<vmem>>) attributes {dimension_semantics = [#tpu.dimension_semantics<parallel>], iteration_bounds = array<i64: 1>, scalar_prefetch = 0 : i64, scratch_operands = 0 : i64, tpu.core_type = #tpu.core_type<tc>, window_params = [{transform_indices = @transform_0, window_bounds = array<i64: 4, 128>}, {pipeline_mode = #tpu.pipeline_mode<synchronous>, transform_indices = @transform_1, window_bounds = array<i64: 256, 4>}, {pipeline_mode = #tpu.pipeline_mode<synchronous>, transform_indices = @transform_2, window_bounds = array<i64: 256, 1>}, {pipeline_mode = #tpu.pipeline_mode<synchronous>, transform_indices = @transform_3, window_bounds = array<i64: 128, 256>}, {pipeline_mode = #tpu.pipeline_mode<synchronous>, transform_indices = @transform_4, window_bounds = array<i64: 128, 1>}, {pipeline_mode = #tpu.pipeline_mode<synchronous>, transform_indices = @transform_5, window_bounds = array<i64: 64, 128>}, {pipeline_mode = #tpu.pipeline_mode<synchronous>, transform_indices = @transform_6, window_bounds = array<i64: 64, 1>}, {pipeline_mode = #tpu.pipeline_mode<synchronous>, transform_indices = @transform_7, window_bounds = array<i64: 32, 64>}, {pipeline_mode = #tpu.pipeline_mode<synchronous>, transform_indices = @transform_8, window_bounds = array<i64: 32, 1>}, {pipeline_mode = #tpu.pipeline_mode<synchronous>, transform_indices = @transform_9, window_bounds = array<i64: 8, 32>}, {pipeline_mode = #tpu.pipeline_mode<synchronous>, transform_indices = @transform_10, window_bounds = array<i64: 8, 1>}, {transform_indices = @transform_11, window_bounds = array<i64: 8, 128>}]} {
    %c0 = arith.constant 0 : index
    %c0_0 = arith.constant 0 : index
    %0 = vector.load %arg1[%c0, %c0_0] : memref<4x128xf32, #tpu.memory_space<vmem>>, vector<4x128xf32>
    %c0_1 = arith.constant 0 : index
    %c0_2 = arith.constant 0 : index
    %1 = vector.load %arg2[%c0_1, %c0_2] : memref<256x4xbf16, #tpu.memory_space<vmem>>, vector<256x4xbf16>
    %2 = arith.truncf %0 : vector<4x128xf32> to vector<4x128xbf16>
    %cst = arith.constant dense<0.000000e+00> : vector<256x128xf32>
    %3 = tpu.matmul %1, %2, %cst {dimension_numbers = #tpu.dot_dimension_numbers<[1], [0], [0], [1], [0, 0, 1, 1], [], []>} : vector<256x4xbf16>, vector<4x128xbf16>, vector<256x128xf32> -> vector<256x128xf32>
    %c0_3 = arith.constant 0 : index
    %c0_4 = arith.constant 0 : index
    %4 = vector.load %arg3[%c0_3, %c0_4] : memref<256x1xf32, #tpu.memory_space<vmem>>, vector<256x1xf32>
    %5 = vector.broadcast %4 : vector<256x1xf32> to vector<256x128xf32>
    %6 = arith.addf %3, %5 : vector<256x128xf32>
    %cst_5 = arith.constant 0.000000e+00 : f32
    %7 = vector.broadcast %cst_5 : f32 to vector<256x128xf32>
    %8 = arith.maximumf %6, %7 : vector<256x128xf32>
    %c0_6 = arith.constant 0 : index
    %c0_7 = arith.constant 0 : index
    %9 = vector.load %arg4[%c0_6, %c0_7] : memref<128x256xbf16, #tpu.memory_space<vmem>>, vector<128x256xbf16>
    %10 = arith.truncf %8 : vector<256x128xf32> to vector<256x128xbf16>
    %cst_8 = arith.constant dense<0.000000e+00> : vector<128x128xf32>
    %11 = tpu.matmul %9, %10, %cst_8 {dimension_numbers = #tpu.dot_dimension_numbers<[1], [0], [0], [1], [0, 0, 1, 1], [], []>} : vector<128x256xbf16>, vector<256x128xbf16>, vector<128x128xf32> -> vector<128x128xf32>
    %c0_9 = arith.constant 0 : index
    %c0_10 = arith.constant 0 : index
    %12 = vector.load %arg5[%c0_9, %c0_10] : memref<128x1xf32, #tpu.memory_space<vmem>>, vector<128x1xf32>
    %13 = vector.broadcast %12 : vector<128x1xf32> to vector<128x128xf32>
    %14 = arith.addf %11, %13 : vector<128x128xf32>
    %cst_11 = arith.constant 0.000000e+00 : f32
    %15 = vector.broadcast %cst_11 : f32 to vector<128x128xf32>
    %16 = arith.maximumf %14, %15 : vector<128x128xf32>
    %c0_12 = arith.constant 0 : index
    %c0_13 = arith.constant 0 : index
    %17 = vector.load %arg6[%c0_12, %c0_13] : memref<64x128xbf16, #tpu.memory_space<vmem>>, vector<64x128xbf16>
    %18 = arith.truncf %16 : vector<128x128xf32> to vector<128x128xbf16>
    %cst_14 = arith.constant dense<0.000000e+00> : vector<64x128xf32>
    %19 = tpu.matmul %17, %18, %cst_14 {dimension_numbers = #tpu.dot_dimension_numbers<[1], [0], [0], [1], [0, 0, 1, 1], [], []>} : vector<64x128xbf16>, vector<128x128xbf16>, vector<64x128xf32> -> vector<64x128xf32>
    %c0_15 = arith.constant 0 : index
    %c0_16 = arith.constant 0 : index
    %20 = vector.load %arg7[%c0_15, %c0_16] : memref<64x1xf32, #tpu.memory_space<vmem>>, vector<64x1xf32>
    %21 = vector.broadcast %20 : vector<64x1xf32> to vector<64x128xf32>
    %22 = arith.addf %19, %21 : vector<64x128xf32>
    %cst_17 = arith.constant 0.000000e+00 : f32
    %23 = vector.broadcast %cst_17 : f32 to vector<64x128xf32>
    %24 = arith.maximumf %22, %23 : vector<64x128xf32>
    %c0_18 = arith.constant 0 : index
    %c0_19 = arith.constant 0 : index
    %25 = vector.load %arg8[%c0_18, %c0_19] : memref<32x64xbf16, #tpu.memory_space<vmem>>, vector<32x64xbf16>
    %26 = arith.truncf %24 : vector<64x128xf32> to vector<64x128xbf16>
    %cst_20 = arith.constant dense<0.000000e+00> : vector<32x128xf32>
    %27 = tpu.matmul %25, %26, %cst_20 {dimension_numbers = #tpu.dot_dimension_numbers<[1], [0], [0], [1], [0, 0, 1, 1], [], []>} : vector<32x64xbf16>, vector<64x128xbf16>, vector<32x128xf32> -> vector<32x128xf32>
    %c0_21 = arith.constant 0 : index
    %c0_22 = arith.constant 0 : index
    %28 = vector.load %arg9[%c0_21, %c0_22] : memref<32x1xf32, #tpu.memory_space<vmem>>, vector<32x1xf32>
    %29 = vector.broadcast %28 : vector<32x1xf32> to vector<32x128xf32>
    %30 = arith.addf %27, %29 : vector<32x128xf32>
    %cst_23 = arith.constant 0.000000e+00 : f32
    %31 = vector.broadcast %cst_23 : f32 to vector<32x128xf32>
    %32 = arith.maximumf %30, %31 : vector<32x128xf32>
    %c0_24 = arith.constant 0 : index
    %c0_25 = arith.constant 0 : index
    %33 = vector.load %arg10[%c0_24, %c0_25] : memref<8x32xbf16, #tpu.memory_space<vmem>>, vector<8x32xbf16>
    %34 = arith.truncf %32 : vector<32x128xf32> to vector<32x128xbf16>
    %cst_26 = arith.constant dense<0.000000e+00> : vector<8x128xf32>
    %35 = tpu.matmul %33, %34, %cst_26 {dimension_numbers = #tpu.dot_dimension_numbers<[1], [0], [0], [1], [0, 0, 1, 1], [], []>} : vector<8x32xbf16>, vector<32x128xbf16>, vector<8x128xf32> -> vector<8x128xf32>
    %c0_27 = arith.constant 0 : index
    %c0_28 = arith.constant 0 : index
    %36 = vector.load %arg11[%c0_27, %c0_28] : memref<8x1xf32, #tpu.memory_space<vmem>>, vector<8x1xf32>
    %37 = vector.broadcast %36 : vector<8x1xf32> to vector<8x128xf32>
    %38 = arith.addf %35, %37 : vector<8x128xf32>
    %c0_29 = arith.constant 0 : index
    %c0_30 = arith.constant 0 : index
    %39 = vector.load %arg12[%c0_29, %c0_30] : memref<8x128xf32, #tpu.memory_space<vmem>>, vector<8x128xf32>
    tpu.vector_store %arg12[%c0_29, %c0_30], %38 {strides = array<i32>} : memref<8x128xf32, #tpu.memory_space<vmem>>, vector<8x128xf32>,
    return
  }
  func.func @transform_0(%arg0: i32) -> (i32, i32) {
    %c0_i32 = arith.constant 0 : i32
    %c0_i32_0 = arith.constant 0 : i32
    return %c0_i32, %arg0 : i32, i32
  }
  func.func @transform_1(%arg0: i32) -> (i32, i32) {
    %c0_i32 = arith.constant 0 : i32
    %c0_i32_0 = arith.constant 0 : i32
    %c0_i32_1 = arith.constant 0 : i32
    return %c0_i32, %c0_i32_0 : i32, i32
  }
  func.func @transform_2(%arg0: i32) -> (i32, i32) {
    %c0_i32 = arith.constant 0 : i32
    %c0_i32_0 = arith.constant 0 : i32
    %c0_i32_1 = arith.constant 0 : i32
    return %c0_i32, %c0_i32_0 : i32, i32
  }
  func.func @transform_3(%arg0: i32) -> (i32, i32) {
    %c0_i32 = arith.constant 0 : i32
    %c0_i32_0 = arith.constant 0 : i32
    %c0_i32_1 = arith.constant 0 : i32
    return %c0_i32, %c0_i32_0 : i32, i32
  }
  func.func @transform_4(%arg0: i32) -> (i32, i32) {
    %c0_i32 = arith.constant 0 : i32
    %c0_i32_0 = arith.constant 0 : i32
    %c0_i32_1 = arith.constant 0 : i32
    return %c0_i32, %c0_i32_0 : i32, i32
  }
  func.func @transform_5(%arg0: i32) -> (i32, i32) {
    %c0_i32 = arith.constant 0 : i32
    %c0_i32_0 = arith.constant 0 : i32
    %c0_i32_1 = arith.constant 0 : i32
    return %c0_i32, %c0_i32_0 : i32, i32
  }
  func.func @transform_6(%arg0: i32) -> (i32, i32) {
    %c0_i32 = arith.constant 0 : i32
    %c0_i32_0 = arith.constant 0 : i32
    %c0_i32_1 = arith.constant 0 : i32
    return %c0_i32, %c0_i32_0 : i32, i32
  }
  func.func @transform_7(%arg0: i32) -> (i32, i32) {
    %c0_i32 = arith.constant 0 : i32
    %c0_i32_0 = arith.constant 0 : i32
    %c0_i32_1 = arith.constant 0 : i32
    return %c0_i32, %c0_i32_0 : i32, i32
  }
  func.func @transform_8(%arg0: i32) -> (i32, i32) {
    %c0_i32 = arith.constant 0 : i32
    %c0_i32_0 = arith.constant 0 : i32
    %c0_i32_1 = arith.constant 0 : i32
    return %c0_i32, %c0_i32_0 : i32, i32
  }
  func.func @transform_9(%arg0: i32) -> (i32, i32) {
    %c0_i32 = arith.constant 0 : i32
    %c0_i32_0 = arith.constant 0 : i32
    %c0_i32_1 = arith.constant 0 : i32
    return %c0_i32, %c0_i32_0 : i32, i32
  }
  func.func @transform_10(%arg0: i32) -> (i32, i32) {
    %c0_i32 = arith.constant 0 : i32
    %c0_i32_0 = arith.constant 0 : i32
    %c0_i32_1 = arith.constant 0 : i32
    return %c0_i32, %c0_i32_0 : i32, i32
  }
  func.func @transform_11(%arg0: i32) -> (i32, i32) {
    %c0_i32 = arith.constant 0 : i32
    %c0_i32_0 = arith.constant 0 : i32
    return %c0_i32, %arg0 : i32, i32
  }
}

</mosaic_0001>

<bundles_post_ra>
// kernel: tpu_custom_call.1
= control target key start
LH: loop header
LB: loop body
LE: loop exit
PB: predicated region body
PF: predicated region fallthrough
CT: control target
= control target key end

     0   :  { %vm395_vm0 = vcmask 1041408   ;;  %v1558_v3 = vmov 0   ;;  %vm346_vm1 = vcmask 31744   ;;  %s2027_s0 = inlined_call_operand.vmem [shape: f32[4,128], index: 0, kind: input, shape index: {}]   ;;  %s2028_s1 = inlined_call_operand.vmem [shape: bf16[256,4], index: 1, kind: input, shape index: {}]   ;;  %s2029_s2 = inlined_call_operand.vmem [shape: f32[256,1], index: 2, kind: input, shape index: {}]   ;;  %s2030_s3 = inlined_call_operand.vmem [shape: bf16[128,256], index: 3, kind: input, shape index: {}]   ;;  %s2031_s4 = inlined_call_operand.vmem [shape: f32[128,1], index: 4, kind: input, shape index: {}]   ;;  %s2032_s5 = inlined_call_operand.vmem [shape: bf16[64,128], index: 5, kind: input, shape index: {}]   ;;  %s2033_s6 = inlined_call_operand.vmem [shape: f32[64,1], index: 6, kind: input, shape index: {}]   ;;  %s2034_s7 = inlined_call_operand.vmem [shape: bf16[32,64], index: 7, kind: input, shape index: {}]   ;;  %s2035_s8 = inlined_call_operand.vmem [shape: f32[32,1], index: 8, kind: input, shape index: {}]   ;;  %s2036_s9 = inlined_call_operand.vmem [shape: bf16[8,32], index: 9, kind: input, shape index: {}]   ;;  %s2037_s10 = inlined_call_operand.vmem [shape: f32[8,1], index: 10, kind: input, shape index: {}]   ;;  %s2038_s11 = inlined_call_operand.hbm [shape: f32[8,128], index: 11, kind: output, shape index: {}]  }
   0x1   :  { %v90_v0 = vld [vmem:[%s2029_s2 + $0x80] sm:$0xff]  ;;  %1487 = vset.pattern.permute.xlu1 %v1558_v3  ;;  %1486 = vset.pattern.permute.xlu0 %v1558_v3  ;;  %v91_v5 = vld [vmem:[%s2029_s2 + $0x88] sm:$0xff]  ;;  %v1490_v10 = vld [vmem:[%s2028_s1 + $0x10] sm:$0xff]  }
   0x2   :  { %v74_v1 = vld [vmem:[%s2029_s2] sm:$0xff]  ;;  %188 = vperm.xlu0 %1486, %v90_v0   ;;  %v75_v8 = vld [vmem:[%s2029_s2 + $0x8] sm:$0xff]  ;;  %v92_v11 = vld [vmem:[%s2029_s2 + $0x90] sm:$0xff] }
   0x3   :  { %v40_v2 = vld [vmem:[%s2027_s0] sm:$0xf]  ;;  %108 = vperm.xlu1 %1487, %v74_v1   ;;  %v1489_v9 = vld [vmem:[%s2028_s1 + $0x8] sm:$0xff]   ;;  %v93_v12 = vld [vmem:[%s2029_s2 + $0x98] sm:$0xff] }
   0x4   :  { %v73_v4 = vpack.c.bf16 %v40_v2, %v40_v2  ;;  %v1488_v6 = vld [vmem:[%s2028_s1] sm:$0xff]   ;;  %v76_v13 = vld [vmem:[%s2029_s2 + $0x10] sm:$0xff]  ;;  %v77_v14 = vld [vmem:[%s2029_s2 + $0x18] sm:$0xff] }
   0x5   :  { %1405 = vmatprep.mubr.msk.bf16.mxu0 %vm346_vm1, %v1488_v6  ;;  %v1491_v15 = vld [vmem:[%s2028_s1 + $0x18] sm:$0xff]   ;;  %v1492_v16 = vld [vmem:[%s2028_s1 + $0x20] sm:$0xff]   ;;  %v95_v18 = vld [vmem:[%s2029_s2 + $0xa8] sm:$0xff] }
   0x6   :  { %1481 = vmatprep.subr.msk.bf16.mxu0 %vm395_vm0, %v73_v4  ;;  %v397_v7 = vsel %vm395_vm0, %v73_v4, 0  ;;  %193 = vperm.xlu0 %1486, %v91_v5   ;;  %v94_v17 = vld [vmem:[%s2029_s2 + $0xa0] sm:$0xff]  ;;  %v79_v20 = vld [vmem:[%s2029_s2 + $0x28] sm:$0xff]  ;;  %v1494_v22 = vld [vmem:[%s2028_s1 + $0x30] sm:$0xff]  }
   0x7   :  { %1404 = vmatpush3.bf16.msra.mxu0 %v397_v7  ;;  %113 = vperm.xlu1 %1487, %v75_v8   ;;  %v78_v19 = vld [vmem:[%s2029_s2 + $0x20] sm:$0xff]  ;;  %v1493_v21 = vld [vmem:[%s2028_s1 + $0x28] sm:$0xff]   ;;  %v96_v23 = vld [vmem:[%s2029_s2 + $0xb0] sm:$0xff] }
   0x8   :  { %v97_v24 = vld [vmem:[%s2029_s2 + $0xb8] sm:$0xff]  ;;  %v80_v25 = vld [vmem:[%s2029_s2 + $0x30] sm:$0xff]  ;;  %v1496_v28 = vld [vmem:[%s2028_s1 + $0x40] sm:$0xff]  }
   0x9   :  { %v81_v26 = vld [vmem:[%s2029_s2 + $0x38] sm:$0xff]  ;;  %v98_v29 = vld [vmem:[%s2029_s2 + $0xc0] sm:$0xff]  ;;  %v99_v30 = vld [vmem:[%s2029_s2 + $0xc8] sm:$0xff] }
   0xa   :  { %1406 = vmatmul.mubr.msk.bf16.vlgmr.msra.gmra.mrb[0].mxu0 %vm346_vm1, %v1489_v9  ;;  %198 = vperm.xlu0 %1486, %v92_v11   ;;  %v1495_v27 = vld [vmem:[%s2028_s1 + $0x38] sm:$0xff]   ;;  %v82_v31 = vld [vmem:[%s2029_s2 + $0x40] sm:$0xff]  ;;  %v83_v32 = vld [vmem:[%s2029_s2 + $0x48] sm:$0xff] }
   0xb   :  { %1409 = vmatprep.mubr.msk.bf16.mxu0 %vm346_vm1, %v1490_v10  ;;  %203 = vperm.xlu1 %1487, %v93_v12   ;;  %v1497_v33 = vld [vmem:[%s2028_s1 + $0x48] sm:$0xff]   ;;  %v1498_v34 = vld [vmem:[%s2028_s1 + $0x50] sm:$0xff]   ;;  %v101_v36 = vld [vmem:[%s2029_s2 + $0xd8] sm:$0xff] }
   0xc   :  { %v100_v35 = vld [vmem:[%s2029_s2 + $0xd0] sm:$0xff]  ;;  %v85_v38 = vld [vmem:[%s2029_s2 + $0x58] sm:$0xff]  ;;  %v1500_v40 = vld [vmem:[%s2028_s1 + $0x60] sm:$0xff]  }
   0xd   :  { %v84_v37 = vld [vmem:[%s2029_s2 + $0x50] sm:$0xff]  ;;  %v1499_v39 = vld [vmem:[%s2028_s1 + $0x58] sm:$0xff]  }
   0xe   :  { %118 = vperm.xlu0 %1486, %v76_v13  }
   0xf   :  { %123 = vperm.xlu1 %1487, %v77_v14  }
  0x12   :  { %1410 = vmatmul.mubr.msk.bf16.gmra.mrb[4].mxu0 %vm346_vm1, %v1491_v15  ;;  %208 = vperm.xlu0 %1486, %v94_v17  }
  0x13   :  { %1413 = vmatprep.mubr.msk.bf16.mxu0 %vm346_vm1, %v1492_v16  ;;  %213 = vperm.xlu1 %1487, %v95_v18  }
  0x16   :  { %128 = vperm.xlu0 %1486, %v78_v19  }
  0x17   :  { %133 = vperm.xlu1 %1487, %v79_v20  }
  0x1a   :  { %1414 = vmatmul.mubr.msk.bf16.gmra.mrb[8].mxu0 %vm346_vm1, %v1493_v21  ;;  %218 = vperm.xlu0 %1486, %v96_v23  }
  0x1b   :  { %1417 = vmatprep.mubr.msk.bf16.mxu0 %vm346_vm1, %v1494_v22  ;;  %223 = vperm.xlu1 %1487, %v97_v24  }
  0x1e   :  { %138 = vperm.xlu0 %1486, %v80_v25  }
  0x1f   :  { %143 = vperm.xlu1 %1487, %v81_v26  }
  0x22   :  { %1418 = vmatmul.mubr.msk.bf16.gmra.mrb[12].mxu0 %vm346_vm1, %v1495_v27  ;;  %228 = vperm.xlu0 %1486, %v98_v29  }
  0x23   :  { %1421 = vmatprep.mubr.msk.bf16.mxu0 %vm346_vm1, %v1496_v28  ;;  %233 = vperm.xlu1 %1487, %v99_v30  }
  0x26   :  { %148 = vperm.xlu0 %1486, %v82_v31  }
  0x27   :  { %153 = vperm.xlu1 %1487, %v83_v32  }
  0x2a   :  { %1422 = vmatmul.mubr.msk.bf16.gmra.mrb[16].mxu0 %vm346_vm1, %v1497_v33  ;;  %238 = vperm.xlu0 %1486, %v100_v35  }
  0x2b   :  { %1425 = vmatprep.mubr.msk.bf16.mxu0 %vm346_vm1, %v1498_v34  ;;  %243 = vperm.xlu1 %1487, %v101_v36  }
  0x2e   :  { %158 = vperm.xlu0 %1486, %v84_v37  }
  0x2f   :  { %163 = vperm.xlu1 %1487, %v85_v38  }
  0x30   :  { %16 = vsyncpa [#allocation3], 0  ;;  %v102_v41 = vld [vmem:[%s2029_s2 + $0xe0] sm:$0xff]  ;;  %v103_v42 = vld [vmem:[%s2029_s2 + $0xe8] sm:$0xff]  ;;  %vm1116_vm2 = vcmask 523264   ;;  %vm1560_vm3 = vmmov 0  }
  0x31   :  { %v86_v43 = vld [vmem:[%s2029_s2 + $0x60] sm:$0xff]  ;;  %v87_v44 = vld [vmem:[%s2029_s2 + $0x68] sm:$0xff]  ;;  %v1502_v46 = vld [vmem:[%s2028_s1 + $0x70] sm:$0xff]   ;;  %vm1185_vm4 = vcmask 261120   ;;  %s1561_s19 = smov [#allocation2]  }
  0x32   :  { %1426 = vmatmul.mubr.msk.bf16.gmra.mrb[20].mxu0 %vm346_vm1, %v1499_v39  ;;  %248 = vperm.xlu0 %1486, %v102_v41   ;;  %v1501_v45 = vld [vmem:[%s2028_s1 + $0x68] sm:$0xff]   ;;  %v104_v47 = vld [vmem:[%s2029_s2 + $0xf0] sm:$0xff]  ;;  %v105_v48 = vld [vmem:[%s2029_s2 + $0xf8] sm:$0xff] }
  0x33   :  { %1429 = vmatprep.mubr.msk.bf16.mxu0 %vm346_vm1, %v1500_v40  ;;  %253 = vperm.xlu1 %1487, %v103_v42   ;;  %v88_v49 = vld [vmem:[%s2029_s2 + $0x70] sm:$0xff]  ;;  %v89_v50 = vld [vmem:[%s2029_s2 + $0x78] sm:$0xff]  ;;  %v624_v52 = vld [vmem:[%s2031_s4] sm:$0xff]  ;;  %s1236_s2 = sshll.u32 %s1561_s19, 4  ;;  %s1237_s2 = int_to_ptr.vmem [resolvable:$true] %s1236_s2 }
  0x34   :  { %v1503_v51 = vld [vmem:[%s2028_s1 + $0x78] sm:$0xff]   ;;  %v625_v53 = vld [vmem:[%s2031_s4 + $0x8] sm:$0xff]  ;;  %v626_v54 = vld [vmem:[%s2031_s4 + $0x10] sm:$0xff]  ;;  %s1534_s20 = scalar_lea.vmem %s1237_s2, 128  ;;  %p1539_p1 = scmp.lt.s32.totalorder %s1237_s2, %s1237_s2 }
  0x35   :  { %v627_v55 = vld [vmem:[%s2031_s4 + $0x18] sm:$0xff]  ;;  %v628_v56 = vld [vmem:[%s2031_s4 + $0x20] sm:$0xff]  ;;  %v629_v57 = vld [vmem:[%s2031_s4 + $0x28] sm:$0xff]  ;;  %p1535_p0 = scmp.ne.s32.totalorder %s1237_s2, %s1534_s20  ;;  %p1540_p2 = scmp.lt.s32.totalorder %s1534_s20, %s1534_s20 }
  0x36   :  { %168 = vperm.xlu0 %1486, %v86_v43   ;;  %v630_v58 = vld [vmem:[%s2031_s4 + $0x30] sm:$0xff]  ;;  %v631_v59 = vld [vmem:[%s2031_s4 + $0x38] sm:$0xff]  ;;  %v632_v60 = vld [vmem:[%s2031_s4 + $0x40] sm:$0xff] }
  0x37   :  { %173 = vperm.xlu1 %1487, %v87_v44   ;;  %v633_v61 = vld [vmem:[%s2031_s4 + $0x48] sm:$0xff]  ;;  %v634_v62 = vld [vmem:[%s2031_s4 + $0x50] sm:$0xff]  ;;  %v635_v63 = vld [vmem:[%s2031_s4 + $0x58] sm:$0xff]  ;;  %p1541_p3 = por %p1540_p2, %p1539_p1 }
  0x38   :  { %v636_v0 = vld [vmem:[%s2031_s4 + $0x60] sm:$0xff]  ;;  %v637_v1 = vld [vmem:[%s2031_s4 + $0x68] sm:$0xff]  ;;  %v638_v2 = vld [vmem:[%s2031_s4 + $0x70] sm:$0xff] }
  0x39   :  { %v639_v3 = vld [vmem:[%s2031_s4 + $0x78] sm:$0xff]  ;;  %v929_v4 = vld [vmem:[%s2033_s6] sm:$0xff]  ;;  %v930_v5 = vld [vmem:[%s2033_s6 + $0x8] sm:$0xff]  ;;  %p1542_p4 = pnand %p1541_p3, %p1535_p0 }
  0x3a   :  { %1430 = vmatmul.mubr.msk.bf16.gmra.mrb[24].mxu0 %vm346_vm1, %v1501_v45  ;;  %258 = vperm.xlu0 %1486, %v104_v47   ;;  %v931_v6 = vld [vmem:[%s2033_s6 + $0x10] sm:$0xff]  ;;  %v932_v7 = vld [vmem:[%s2033_s6 + $0x18] sm:$0xff]  ;;  %v933_v8 = vld [vmem:[%s2033_s6 + $0x20] sm:$0xff] }
  0x3b   :  { %1433 = vmatprep.mubr.msk.bf16.mxu0 %vm346_vm1, %v1502_v46  ;;  %263 = vperm.xlu1 %1487, %v105_v48   ;;  %v934_v9 = vld [vmem:[%s2033_s6 + $0x28] sm:$0xff]  ;;  %v935_v10 = vld [vmem:[%s2033_s6 + $0x30] sm:$0xff]  ;;  %v936_v11 = vld [vmem:[%s2033_s6 + $0x38] sm:$0xff] }
  0x3c   :  { %v1082_v12 = vld [vmem:[%s2035_s8] sm:$0xff]  ;;  %v1083_v13 = vld [vmem:[%s2035_s8 + $0x8] sm:$0xff]  ;;  %v1084_v14 = vld [vmem:[%s2035_s8 + $0x10] sm:$0xff] }
  0x3d   :  { %v1085_v15 = vld [vmem:[%s2035_s8 + $0x18] sm:$0xff]  ;;  %v1179_v16 = vld [vmem:[%s2037_s10] sm:$0xff] }
  0x3e   :  { %178 = vperm.xlu0 %1486, %v88_v49   ;;  %v1506_v21 = vld [vmem:[%s2030_s3 + $0x4] ss:$8 sps:$4 sm:$0xff]  }
  0x3f   :  { %183 = vperm.xlu1 %1487, %v89_v50   ;;  %832 = vmatprep.mubr.bf16.mxu1 %v1506_v21 }
  0x42   :  { %1434 = vmatmul.mubr.msk.bf16.gmra.mrb[28].mxu0 %vm346_vm1, %v1503_v51  ;;  %642 = vperm.xlu0 %1486, %v624_v52  }
  0x43   :  { %647 = vperm.xlu1 %1487, %v625_v53  }
  0x46   :  { %652 = vperm.xlu0 %1486, %v626_v54  }
  0x47   :  { %657 = vperm.xlu1 %1487, %v627_v55  }
  0x4a   :  { %662 = vperm.xlu0 %1486, %v628_v56  }
  0x4b   :  { %667 = vperm.xlu1 %1487, %v629_v57  }
  0x4e   :  { %672 = vperm.xlu0 %1486, %v630_v58  }
  0x4f   :  { %677 = vperm.xlu1 %1487, %v631_v59  }
  0x52   :  { %682 = vperm.xlu0 %1486, %v632_v60  }
  0x53   :  { %687 = vperm.xlu1 %1487, %v633_v61  }
  0x56   :  { %692 = vperm.xlu0 %1486, %v634_v62  }
  0x57   :  { %697 = vperm.xlu1 %1487, %v635_v63  }
  0x5a   :  { %702 = vperm.xlu0 %1486, %v636_v0  }
  0x5b   :  { %707 = vperm.xlu1 %1487, %v637_v1  }
  0x5e   :  { %712 = vperm.xlu0 %1486, %v638_v2  }
  0x5f   :  { %717 = vperm.xlu1 %1487, %v639_v3  }
  0x62   :  { %939 = vperm.xlu0 %1486, %v929_v4  }
  0x63   :  { %944 = vperm.xlu1 %1487, %v930_v5  }
  0x66   :  { %949 = vperm.xlu0 %1486, %v931_v6  }
  0x67   :  { %954 = vperm.xlu1 %1487, %v932_v7  }
  0x6a   :  { %959 = vperm.xlu0 %1486, %v933_v8  }
  0x6b   :  { %964 = vperm.xlu1 %1487, %v934_v9  }
  0x6e   :  { %969 = vperm.xlu0 %1486, %v935_v10  }
  0x6f   :  { %974 = vperm.xlu1 %1487, %v936_v11  }
  0x72   :  { %1088 = vperm.xlu0 %1486, %v1082_v12  }
  0x73   :  { %1093 = vperm.xlu1 %1487, %v1083_v13  }
  0x76   :  { %1098 = vperm.xlu0 %1486, %v1084_v14  }
  0x77   :  { %1103 = vperm.xlu1 %1487, %v1085_v15  }
  0x7a   :  { %1182 = vperm.xlu0 %1486, %v1179_v16  }
  0x81   :  { %v1872_v17 = vpop.permute.xlu0 %188 }
  0x82   :  { %v109_v18 = vpop.permute.xlu1 %108 }
  0x85   :  { %v1874_v19 = vpop.permute.xlu0 %193 }
  0x86   :  { %v114_v20 = vpop.permute.xlu1 %113 }
  0x89   :  { %v1879_v22 = vpop.permute.xlu0 %198 }
  0x8a   :  { %v1881_v23 = vpop.permute.xlu1 %203 }
  0x8d   :  { %v119_v24 = vpop.permute.xlu0 %118 }
  0x8e   :  { %v124_v25 = vpop.permute.xlu1 %123 }
  0x91   :  { %v1883_v26 = vpop.permute.xlu0 %208 }
  0x92   :  { %v1885_v27 = vpop.permute.xlu1 %213 }
  0x95   :  { %v129_v28 = vpop.permute.xlu0 %128 }
  0x96   :  { %v134_v29 = vpop.permute.xlu1 %133 }
  0x99   :  { %v1887_v30 = vpop.permute.xlu0 %218 }
  0x9a   :  { %v1889_v31 = vpop.permute.xlu1 %223 }
  0x9d   :  { %v139_v32 = vpop.permute.xlu0 %138 }
  0x9e   :  { %v144_v33 = vpop.permute.xlu1 %143 }
  0xa1   :  { %v1891_v34 = vpop.permute.xlu0 %228 }
  0xa2   :  { %v1893_v35 = vpop.permute.xlu1 %233 }
  0xa5   :  { %v149_v36 = vpop.permute.xlu0 %148 }
  0xa6   :  { %v154_v37 = vpop.permute.xlu1 %153 }
  0xa9   :  { %v1895_v38 = vpop.permute.xlu0 %238 }
  0xaa   :  { %v1897_v39 = vpop.permute.xlu1 %243 }
  0xad   :  { %v159_v40 = vpop.permute.xlu0 %158 }
  0xae   :  { %v164_v44 = vpop.permute.xlu1 %163 }
  0xb1   :  { %v1899_v52 = vpop.permute.xlu0 %248 }
  0xb2   :  { %v1903_v56 = vpop.permute.xlu1 %253 }
  0xb5   :  { %v169_v0 = vpop.permute.xlu0 %168 }
  0xb6   :  { %v174_v5 = vpop.permute.xlu1 %173 }
  0xb9   :  { %v1911_v13 = vpop.permute.xlu0 %258 }
  0xdd   :  { %v1407_v41 = vpop.f32.mrb[0].mxu0 }
  0xde   :  { %v442_v42 = vadd.f32 %v1407_v41, %v119_v24  ;;  %v433_v43 = vpop.f32.mrb[1].mxu0 }
  0xdf   :  { %v1408_v45 = vpop.f32.mrb[2].mxu0  ;;  %v434_v46 = vadd.f32 %v433_v43, %v109_v18  ;;  %v1913_v18 = vpop.permute.xlu1 %263 }
  0xe0   :  { %v445_v47 = vadd.f32 %v1408_v45, %v124_v25  ;;  %v436_v48 = vpop.f32.mrb[3].mxu0  ;;  %v562_v49 = vmax.f32 %v442_v42, 0.0 }
  0xe1   :  { %v437_v51 = vadd.f32 %v436_v48, %v114_v20  ;;  %v560_v53 = vmax.f32 %v434_v46, 0.0 }
  0xe2   :  { %v563_v50 = vmax.f32 %v445_v47, 0.0 }
  0xe3   :  { %v561_v55 = vmax.f32 %v437_v51, 0.0  ;;  %v184_v45 = vpop.permute.xlu1 %183 }
  0xe4   :  { %v1901_v54 = vpack.c.bf16 %v563_v50, %v562_v49 }
  0xe5   :  { %v1411_v57 = vpop.f32.mrb[4].mxu0  ;;  %v1905_v60 = vpack.c.bf16 %v561_v55, %v560_v53 }
  0xe6   :  { %v458_v58 = vadd.f32 %v1411_v57, %v139_v32  ;;  %v449_v59 = vpop.f32.mrb[5].mxu0 }
  0xe7   :  { %v1412_v61 = vpop.f32.mrb[6].mxu0  ;;  %v450_v62 = vadd.f32 %v449_v59, %v129_v28 }
  0xe8   :  { %v461_v63 = vadd.f32 %v1412_v61, %v144_v33  ;;  %v452_v1 = vpop.f32.mrb[7].mxu0  ;;  %v566_v2 = vmax.f32 %v458_v58, 0.0  ;;  %v179_v33 = vpop.permute.xlu0 %178 }
  0xe9   :  { %v453_v4 = vadd.f32 %v452_v1, %v134_v29  ;;  %v564_v6 = vmax.f32 %v450_v62, 0.0 }
  0xea   :  { %v567_v3 = vmax.f32 %v461_v63, 0.0 }
  0xeb   :  { %v565_v8 = vmax.f32 %v453_v4, 0.0 }
  0xec   :  { %v1907_v7 = vpack.c.bf16 %v567_v3, %v566_v2 }
  0xed   :  { %v1415_v9 = vpop.f32.mrb[8].mxu0  ;;  %v1909_v10 = vpack.c.bf16 %v565_v8, %v564_v6 }
  0xee   :  { %v474_v11 = vadd.f32 %v1415_v9, %v159_v40  ;;  %v465_v12 = vpop.f32.mrb[9].mxu0 }
  0xef   :  { %v1416_v14 = vpop.f32.mrb[10].mxu0  ;;  %v466_v15 = vadd.f32 %v465_v12, %v149_v36 }
  0xf0   :  { %v477_v16 = vadd.f32 %v1416_v14, %v164_v44  ;;  %v468_v20 = vpop.f32.mrb[11].mxu0  ;;  %v570_v21 = vmax.f32 %v474_v11, 0.0 }
  0xf1   :  { %v469_v25 = vadd.f32 %v468_v20, %v154_v37  ;;  %v568_v28 = vmax.f32 %v466_v15, 0.0 }
  0xf2   :  { %v571_v24 = vmax.f32 %v477_v16, 0.0 }
  0xf3   :  { %v569_v32 = vmax.f32 %v469_v25, 0.0 }
  0xf4   :  { %v1915_v29 = vpack.c.bf16 %v571_v24, %v570_v21 }
  0xf5   :  { %v1419_v41 = vpop.f32.mrb[12].mxu0  ;;  %v1917_v42 = vpack.c.bf16 %v569_v32, %v568_v28 }
  0xf6   :  { %v490_v40 = vadd.f32 %v1419_v41, %v179_v33  ;;  %v481_v43 = vpop.f32.mrb[13].mxu0 }
  0xf7   :  { %v1420_v46 = vpop.f32.mrb[14].mxu0  ;;  %v482_v36 = vadd.f32 %v481_v43, %v169_v0 }
  0xf8   :  { %v493_v44 = vadd.f32 %v1420_v46, %v184_v45  ;;  %v484_v47 = vpop.f32.mrb[15].mxu0  ;;  %v574_v48 = vmax.f32 %v490_v40, 0.0 }
  0xf9   :  { %v485_v50 = vadd.f32 %v484_v47, %v174_v5  ;;  %v572_v51 = vmax.f32 %v482_v36, 0.0 }
  0xfa   :  { %v575_v49 = vmax.f32 %v493_v44, 0.0 }
  0xfb   :  { %v573_v53 = vmax.f32 %v485_v50, 0.0 }
  0xfc   :  { %v1919_v37 = vpack.c.bf16 %v575_v49, %v574_v48 }
  0xfd   :  { %v1423_v55 = vpop.f32.mrb[16].mxu0  ;;  %v1921_v57 = vpack.c.bf16 %v573_v53, %v572_v51  ;;  %v1515_v53 = vld [vmem:[%s2030_s3 + $0x30] ss:$8 sps:$4 sm:$0xff]  }
  0xfe   :  { %v506_v58 = vadd.f32 %v1423_v55, %v1879_v22  ;;  %v497_v59 = vpop.f32.mrb[17].mxu0  ;;  %v1516_v55 = vld [vmem:[%s2030_s3 + $0x44] ss:$8 sps:$4 sm:$0xff]  }
  0xff   :  { %v498_v61 = vadd.f32 %v497_v59, %v1872_v17  ;;  %v1424_v62 = vpop.f32.mrb[18].mxu0  ;;  %v1521_v59 = vld [vmem:[%s2030_s3 + $0x50] ss:$8 sps:$4 sm:$0xff]  }
 0x100   :  { %v509_v63 = vadd.f32 %v1424_v62, %v1881_v23  ;;  %v500_v0 = vpop.f32.mrb[19].mxu0  ;;  %v578_v2 = vmax.f32 %v506_v58, 0.0  ;;  %v1519_v58 = vld [vmem:[%s2030_s3 + $0x54] ss:$8 sps:$4 sm:$0xff]   ;;  %v1524_v62 = vld [vmem:[%s2030_s3 + $0x60] ss:$8 sps:$4 sm:$0xff]  }
 0x101   :  { %v501_v1 = vadd.f32 %v500_v0, %v1874_v19  ;;  %v576_v4 = vmax.f32 %v498_v61, 0.0  ;;  %v1522_v61 = vld [vmem:[%s2030_s3 + $0x64] ss:$8 sps:$4 sm:$0xff]   ;;  %v1527_v0 = vld [vmem:[%s2030_s3 + $0x70] ss:$8 sps:$4 sm:$0xff]  }
 0x102   :  { %v579_v3 = vmax.f32 %v509_v63, 0.0  ;;  %v1525_v63 = vld [vmem:[%s2030_s3 + $0x74] ss:$8 sps:$4 sm:$0xff]  }
 0x103   :  { %v577_v5 = vmax.f32 %v501_v1, 0.0  ;;  %v1528_v1 = vld [vmem:[%s2032_s5] sm:$0xff]  }
 0x104   :  { %v617_v6 = vpack.c.bf16 %v579_v3, %v578_v2  ;;  %1453 = vmatprep.mubr.bf16.mxu0 %v1528_v1 }
 0x105   :  { %v1427_v8 = vpop.f32.mrb[20].mxu0  ;;  %v616_v9 = vpack.c.bf16 %v577_v5, %v576_v4 }
 0x106   :  { %v522_v11 = vadd.f32 %v1427_v8, %v1887_v30  ;;  %v513_v12 = vpop.f32.mrb[21].mxu0 }
 0x107   :  { %v514_v22 = vadd.f32 %v513_v12, %v1883_v26  ;;  %v1428_v14 = vpop.f32.mrb[22].mxu0  ;;  %1318 = vmatprep.subr.bf16.mxu1 %v616_v9  ;;  %v648_v12 = vpop.permute.xlu1 %647 }
 0x108   :  { %v525_v17 = vadd.f32 %v1428_v14, %v1889_v31  ;;  %v516_v23 = vpop.f32.mrb[23].mxu0  ;;  %1319 = vmatpush3.bf16.msra.mxu1 %v1905_v60  ;;  %v582_v15 = vmax.f32 %v522_v11, 0.0 }
 0x109   :  { %v517_v19 = vadd.f32 %v516_v23, %v1885_v27  ;;  %1320 = vmatprep.subr.bf16.mxu1 %v617_v6  ;;  %v580_v20 = vmax.f32 %v514_v22, 0.0  ;;  %v643_v6 = vpop.permute.xlu0 %642 }
 0x10a   :  { %v583_v16 = vmax.f32 %v525_v17, 0.0 }
 0x10b   :  { %v581_v21 = vmax.f32 %v517_v19, 0.0 }
 0x10c   :  { %v619_v24 = vpack.c.bf16 %v583_v16, %v582_v15  ;;  %1321 = vmatpush3.bf16.msra.mxu1 %v1901_v54 }
 0x10d   :  { %v618_v30 = vpack.c.bf16 %v581_v21, %v580_v20  ;;  %v1431_v25 = vpop.f32.mrb[24].mxu0  ;;  %v653_v21 = vpop.permute.xlu0 %652 }
 0x10e   :  { %v538_v26 = vadd.f32 %v1431_v25, %v1895_v38  ;;  %v529_v28 = vpop.f32.mrb[25].mxu0 }
 0x10f   :  { %v530_v31 = vadd.f32 %v529_v28, %v1891_v34  ;;  %v1432_v32 = vpop.f32.mrb[26].mxu0  ;;  %1322 = vmatprep.subr.bf16.mxu1 %v618_v30 }
 0x110   :  { %v541_v60 = vadd.f32 %v1432_v32, %v1897_v39  ;;  %v532_v27 = vpop.f32.mrb[27].mxu0  ;;  %1323 = vmatpush3.bf16.msra.mxu1 %v1909_v10  ;;  %v586_v41 = vmax.f32 %v538_v26, 0.0  ;;  %v658_v26 = vpop.permute.xlu1 %657 }
 0x111   :  { %v533_v33 = vadd.f32 %v532_v27, %v1893_v35  ;;  %1324 = vmatprep.subr.bf16.mxu1 %v619_v24  ;;  %v584_v54 = vmax.f32 %v530_v31, 0.0 }
 0x112   :  { %v587_v40 = vmax.f32 %v541_v60, 0.0 }
 0x113   :  { %v585_v43 = vmax.f32 %v533_v33, 0.0 }
 0x114   :  { %v621_v45 = vpack.c.bf16 %v587_v40, %v586_v41  ;;  %1325 = vmatpush3.bf16.msra.mxu1 %v1907_v7 }
 0x115   :  { %v620_v38 = vpack.c.bf16 %v585_v43, %v584_v54  ;;  %v1435_v46 = vpop.f32.mrb[28].mxu0  ;;  %v663_v54 = vpop.permute.xlu0 %662 }
 0x116   :  { %v554_v34 = vadd.f32 %v1435_v46, %v1911_v13  ;;  %v545_v36 = vpop.f32.mrb[29].mxu0  ;;  %v668_v46 = vpop.permute.xlu1 %667 }
 0x117   :  { %v546_v39 = vadd.f32 %v545_v36, %v1899_v52  ;;  %v1436_v44 = vpop.f32.mrb[30].mxu0  ;;  %1326 = vmatprep.subr.bf16.mxu1 %v620_v38  ;;  %v1504_v52 = vld [vmem:[%s2030_s3] ss:$8 sps:$4 sm:$0xff]  }
 0x118   :  { %v557_v10 = vadd.f32 %v1436_v44, %v1913_v18  ;;  %v548_v35 = vpop.f32.mrb[31].mxu0  ;;  %1327 = vmatpush3.bf16.msra.mxu1 %v1917_v42  ;;  %v590_v48 = vmax.f32 %v554_v34, 0.0  ;;  %v1509_v18 = vld [vmem:[%s2030_s3 + $0x10] ss:$8 sps:$4 sm:$0xff]   ;;  %v1512_v42 = vld [vmem:[%s2030_s3 + $0x20] ss:$8 sps:$4 sm:$0xff]  }
 0x119   :  { %v549_v47 = vadd.f32 %v548_v35, %v1903_v56  ;;  %1328 = vmatprep.subr.bf16.mxu1 %v621_v45  ;;  %v588_v7 = vmax.f32 %v546_v39, 0.0  ;;  %v1507_v56 = vld [vmem:[%s2030_s3 + $0x14] ss:$8 sps:$4 sm:$0xff]  }
 0x11a   :  { %v591_v49 = vmax.f32 %v557_v10, 0.0 }
 0x11b   :  { %v589_v50 = vmax.f32 %v549_v47, 0.0 }
 0x11c   :  { %v623_v51 = vpack.c.bf16 %v591_v49, %v590_v48  ;;  %1329 = vmatpush3.bf16.msra.mxu1 %v1915_v29  ;;  %v1510_v29 = vld [vmem:[%s2030_s3 + $0x24] ss:$8 sps:$4 sm:$0xff]   ;;  %v673_v49 = vpop.permute.xlu0 %672 }
 0x11d   :  { %v622_v13 = vpack.c.bf16 %v589_v50, %v588_v7 }
 0x11f   :  { %1330 = vmatprep.subr.bf16.mxu1 %v622_v13  ;;  %v678_v13 = vpop.permute.xlu1 %677 }
 0x120   :  { %1331 = vmatpush3.bf16.msra.mxu1 %v1921_v57  ;;  %v1518_v57 = vld [vmem:[%s2030_s3 + $0x40] ss:$8 sps:$4 sm:$0xff]  }
 0x121   :  { %1332 = vmatprep.subr.bf16.mxu1 %v623_v51 }
 0x124   :  { %1333 = vmatpush3.bf16.msra.mxu1 %v1919_v37  ;;  %v1513_v37 = vld [vmem:[%s2030_s3 + $0x34] ss:$8 sps:$4 sm:$0xff]  }
 0x127   :  { %833 = vmatmul.mubr.bf16.vlgmr.msra.gmra.mrb[0].mxu1 %v1504_v52 }
 0x128   :  { %840 = vmatprep.mubr.bf16.mxu1 %v1507_v56 }
 0x12f   :  { %841 = vmatmul.mubr.bf16.gmra.mrb[4].mxu1 %v1509_v18 }
 0x130   :  { %848 = vmatprep.mubr.bf16.mxu1 %v1510_v29 }
 0x137   :  { %849 = vmatmul.mubr.bf16.gmra.mrb[8].mxu1 %v1512_v42 }
 0x138   :  { %856 = vmatprep.mubr.bf16.mxu1 %v1513_v37 }
 0x13f   :  { %857 = vmatmul.mubr.bf16.gmra.mrb[12].mxu1 %v1515_v53 }
 0x140   :  { %864 = vmatprep.mubr.bf16.mxu1 %v1516_v55 }
 0x147   :  { %865 = vmatmul.mubr.bf16.gmra.mrb[16].mxu1 %v1518_v57  ;;  %v683_v57 = vpop.permute.xlu0 %682 }
 0x148   :  { %872 = vmatprep.mubr.bf16.mxu1 %v1519_v58 }
 0x14f   :  { %873 = vmatmul.mubr.bf16.gmra.mrb[20].mxu1 %v1521_v59 }
 0x150   :  { %880 = vmatprep.mubr.bf16.mxu1 %v1522_v61 }
 0x157   :  { %881 = vmatmul.mubr.bf16.gmra.mrb[24].mxu1 %v1524_v62  ;;  %v688_v62 = vpop.permute.xlu1 %687 }
 0x158   :  { %888 = vmatprep.mubr.bf16.mxu1 %v1525_v63 }
 0x15f   :  { %889 = vmatmul.mubr.bf16.gmra.mrb[28].mxu1 %v1527_v0 }
 0x1fa   :  { %v1334_v2 = vpop.f32.mrb[0].mxu1 }
 0x1fb   :  { %v1335_v3 = vpop.f32.mrb[1].mxu1 }
 0x1fc   :  { %v1336_v4 = vadd.f32 %v1335_v3, %v1334_v2  ;;  %v1337_v5 = vpop.f32.mrb[2].mxu1 }
 0x1fd   :  { %v1338_v8 = vpop.f32.mrb[3].mxu1 }
 0x1fe   :  { %v835_v9 = vadd.f32 %v1336_v4, %v643_v6  ;;  %v1339_v11 = vadd.f32 %v1338_v8, %v1337_v5  ;;  %v693_v8 = vpop.permute.xlu0 %692 }
 0x200   :  { %v838_v22 = vadd.f32 %v1339_v11, %v648_v12  ;;  %v897_v14 = vmax.f32 %v835_v9, 0.0 }
 0x202   :  { %v898_v17 = vmax.f32 %v838_v22, 0.0  ;;  %v1340_v23 = vpop.f32.mrb[4].mxu1  ;;  %v698_v22 = vpop.permute.xlu1 %697 }
 0x203   :  { %v1341_v19 = vpop.f32.mrb[5].mxu1 }
 0x204   :  { %v1342_v15 = vadd.f32 %v1341_v19, %v1340_v23  ;;  %v1343_v16 = vpop.f32.mrb[6].mxu1  ;;  %v921_v20 = vpack.c.bf16 %v898_v17, %v897_v14 }
 0x205   :  { %v1344_v24 = vpop.f32.mrb[7].mxu1 }
 0x206   :  { %v843_v30 = vadd.f32 %v1342_v15, %v653_v21  ;;  %v1345_v25 = vadd.f32 %v1344_v24, %v1343_v16  ;;  %1437 = vmatprep.subr.bf16.mxu0 %v921_v20  ;;  %v703_v24 = vpop.permute.xlu0 %702 }
 0x207   :  { %1438 = vmatpush3.bf16.msra.mxu0 %v921_v20 }
 0x208   :  { %v846_v28 = vadd.f32 %v1345_v25, %v658_v26  ;;  %v899_v31 = vmax.f32 %v843_v30, 0.0 }
 0x20a   :  { %v900_v32 = vmax.f32 %v846_v28, 0.0  ;;  %v1346_v60 = vpop.f32.mrb[8].mxu1  ;;  %v708_v28 = vpop.permute.xlu1 %707 }
 0x20b   :  { %v1347_v27 = vpop.f32.mrb[9].mxu1 }
 0x20c   :  { %v1348_v33 = vadd.f32 %v1347_v27, %v1346_v60  ;;  %v1349_v41 = vpop.f32.mrb[10].mxu1  ;;  %v922_v40 = vpack.c.bf16 %v900_v32, %v899_v31 }
 0x20d   :  { %v1350_v43 = vpop.f32.mrb[11].mxu1 }
 0x20e   :  { %v851_v45 = vadd.f32 %v1348_v33, %v663_v54  ;;  %v1351_v38 = vadd.f32 %v1350_v43, %v1349_v41  ;;  %1439 = vmatprep.subr.bf16.mxu0 %v922_v40  ;;  %v713_v43 = vpop.permute.xlu0 %712 }
 0x20f   :  { %1440 = vmatpush3.bf16.msra.mxu0 %v922_v40 }
 0x210   :  { %v854_v34 = vadd.f32 %v1351_v38, %v668_v46  ;;  %v901_v36 = vmax.f32 %v851_v45, 0.0 }
 0x212   :  { %v902_v39 = vmax.f32 %v854_v34, 0.0  ;;  %v1352_v44 = vpop.f32.mrb[12].mxu1  ;;  %v718_v34 = vpop.permute.xlu1 %717 }
 0x213   :  { %v1353_v10 = vpop.f32.mrb[13].mxu1 }
 0x214   :  { %v1354_v35 = vadd.f32 %v1353_v10, %v1352_v44  ;;  %v1355_v47 = vpop.f32.mrb[14].mxu1  ;;  %v923_v48 = vpack.c.bf16 %v902_v39, %v901_v36 }
 0x215   :  { %v1356_v7 = vpop.f32.mrb[15].mxu1 }
 0x216   :  { %v859_v50 = vadd.f32 %v1354_v35, %v673_v49  ;;  %v1357_v51 = vadd.f32 %v1356_v7, %v1355_v47  ;;  %1441 = vmatprep.subr.bf16.mxu0 %v923_v48  ;;  %v1529_v35 = vld [vmem:[%s2032_s5 + $0x8] sm:$0xff]   ;;  %v1530_v47 = vld [vmem:[%s2032_s5 + $0x10] sm:$0xff]   ;;  %v1532_v49 = vld [vmem:[%s2034_s7] sm:$0xff]   ;;  %v940_v7 = vpop.permute.xlu0 %939 }
 0x217   :  { %1442 = vmatpush3.bf16.msra.mxu0 %v923_v48  ;;  %v1531_v48 = vld [vmem:[%s2032_s5 + $0x18] sm:$0xff]  }
 0x218   :  { %v862_v52 = vadd.f32 %v1357_v51, %v678_v13  ;;  %v903_v56 = vmax.f32 %v859_v50, 0.0  ;;  %v945_v50 = vpop.permute.xlu1 %944 }
 0x21a   :  { %v904_v18 = vmax.f32 %v862_v52, 0.0  ;;  %v1358_v29 = vpop.f32.mrb[16].mxu1  ;;  %v950_v51 = vpop.permute.xlu0 %949 }
 0x21b   :  { %v1359_v42 = vpop.f32.mrb[17].mxu1 }
 0x21c   :  { %v1360_v37 = vadd.f32 %v1359_v42, %v1358_v29  ;;  %v1361_v53 = vpop.f32.mrb[18].mxu1  ;;  %v924_v55 = vpack.c.bf16 %v904_v18, %v903_v56  ;;  %v955_v13 = vpop.permute.xlu1 %954 }
 0x21d   :  { %v1362_v58 = vpop.f32.mrb[19].mxu1 }
 0x21e   :  { %v867_v59 = vadd.f32 %v1360_v37, %v683_v57  ;;  %v1363_v61 = vadd.f32 %v1362_v58, %v1361_v53  ;;  %1443 = vmatprep.subr.bf16.mxu0 %v924_v55  ;;  %v960_v29 = vpop.permute.xlu0 %959 }
 0x21f   :  { %1444 = vmatpush3.bf16.msra.mxu0 %v924_v55 }
 0x220   :  { %v870_v63 = vadd.f32 %v1363_v61, %v688_v62  ;;  %v905_v0 = vmax.f32 %v867_v59, 0.0  ;;  %v965_v57 = vpop.permute.xlu1 %964 }
 0x222   :  { %v906_v1 = vmax.f32 %v870_v63, 0.0  ;;  %v1364_v2 = vpop.f32.mrb[20].mxu1 }
 0x223   :  { %v1365_v3 = vpop.f32.mrb[21].mxu1 }
 0x224   :  { %v1366_v4 = vadd.f32 %v1365_v3, %v1364_v2  ;;  %v1367_v5 = vpop.f32.mrb[22].mxu1  ;;  %v925_v6 = vpack.c.bf16 %v906_v1, %v905_v0  ;;  %v970_v1 = vpop.permute.xlu0 %969 }
 0x225   :  { %v1368_v9 = vpop.f32.mrb[23].mxu1 }
 0x226   :  { %v875_v11 = vadd.f32 %v1366_v4, %v693_v8  ;;  %v1369_v12 = vadd.f32 %v1368_v9, %v1367_v5  ;;  %1445 = vmatprep.subr.bf16.mxu0 %v925_v6 }
 0x227   :  { %1446 = vmatpush3.bf16.msra.mxu0 %v925_v6  ;;  %v975_v6 = vpop.permute.xlu1 %974 }
 0x228   :  { %v878_v14 = vadd.f32 %v1369_v12, %v698_v22  ;;  %v907_v17 = vmax.f32 %v875_v11, 0.0 }
 0x22a   :  { %v908_v23 = vmax.f32 %v878_v14, 0.0  ;;  %v1370_v19 = vpop.f32.mrb[24].mxu1 }
 0x22b   :  { %v1371_v15 = vpop.f32.mrb[25].mxu1 }
 0x22c   :  { %v1372_v16 = vadd.f32 %v1371_v15, %v1370_v19  ;;  %v1373_v20 = vpop.f32.mrb[26].mxu1  ;;  %v926_v21 = vpack.c.bf16 %v908_v23, %v907_v17 }
 0x22d   :  { %v1374_v30 = vpop.f32.mrb[27].mxu1 }
 0x22e   :  { %v883_v25 = vadd.f32 %v1372_v16, %v703_v24  ;;  %v1375_v26 = vadd.f32 %v1374_v30, %v1373_v20  ;;  %1447 = vmatprep.subr.bf16.mxu0 %v926_v21  ;;  %v1533_v20 = vld [vmem:[%s2034_s7 + $0x8] sm:$0xff]   ;;  %v1089_v24 = vpop.permute.xlu0 %1088  ;;  %v1094_v30 = vpop.permute.xlu1 %1093 }
 0x22f   :  { %1448 = vmatpush3.bf16.msra.mxu0 %v926_v21  ;;  %v1559_v21 = vmov 0.0  }
 0x230   :  { %v886_v31 = vadd.f32 %v1375_v26, %v708_v28  ;;  %v909_v32 = vmax.f32 %v883_v25, 0.0 }
 0x232   :  { %v910_v60 = vmax.f32 %v886_v31, 0.0  ;;  %v1376_v27 = vpop.f32.mrb[28].mxu1  ;;  %v1099_v25 = vpop.permute.xlu0 %1098 }
 0x233   :  { %v1377_v33 = vpop.f32.mrb[29].mxu1 }
 0x234   :  { %v1378_v41 = vadd.f32 %v1377_v33, %v1376_v27  ;;  %v1379_v40 = vpop.f32.mrb[30].mxu1  ;;  %v927_v54 = vpack.c.bf16 %v910_v60, %v909_v32  ;;  %v1104_v32 = vpop.permute.xlu1 %1103 }
 0x235   :  { %v1380_v45 = vpop.f32.mrb[31].mxu1 }
 0x236   :  { %v891_v38 = vadd.f32 %v1378_v41, %v713_v43  ;;  %v1381_v46 = vadd.f32 %v1380_v45, %v1379_v40  ;;  %1449 = vmatprep.subr.bf16.mxu0 %v927_v54 }
 0x237   :  { %1450 = vmatpush3.bf16.msra.mxu0 %v927_v54 }
 0x238   :  { %v894_v36 = vadd.f32 %v1381_v46, %v718_v34  ;;  %v911_v39 = vmax.f32 %v891_v38, 0.0 }
 0x23a   :  { %v912_v44 = vmax.f32 %v894_v36, 0.0  ;;  %v1176_v36 = vld [vmem:[%s2036_s9] sm:$0xf] }
 0x23c   :  { %v928_v10 = vpack.c.bf16 %v912_v44, %v911_v39  ;;  %v1183_v39 = vpop.permute.xlu0 %1182 }
 0x23e   :  { %1451 = vmatprep.subr.bf16.mxu0 %v928_v10 }
 0x23f   :  { %1452 = vmatpush3.bf16.msra.mxu0 %v928_v10 }
 0x242   :  { %1454 = vmatmul.mubr.bf16.vlgmr.msra.gmra.mrb[32].mxu0 %v1529_v35 }
 0x243   :  { %1457 = vmatprep.mubr.bf16.mxu0 %v1530_v47 }
 0x24a   :  { %1458 = vmatmul.mubr.bf16.gmra.mrb[36].mxu0 %v1531_v48 }
 0x24b   :  { %1469 = vmatprep.mubr.msk.bf16.mxu0 %vm1116_vm2, %v1532_v49 }
 0x315   :  { %v1455_v52 = vpop.f32.mrb[32].mxu0 }
 0x316   :  { %v1044_v56 = vadd.f32 %v1455_v52, %v950_v51  ;;  %v1035_v18 = vpop.f32.mrb[33].mxu0 }
 0x317   :  { %v1036_v42 = vadd.f32 %v1035_v18, %v940_v7  ;;  %v1456_v37 = vpop.f32.mrb[34].mxu0 }
 0x318   :  { %v1047_v53 = vadd.f32 %v1456_v37, %v955_v13  ;;  %v1038_v55 = vpop.f32.mrb[35].mxu0  ;;  %v1068_v59 = vmax.f32 %v1044_v56, 0.0 }
 0x319   :  { %v1039_v58 = vadd.f32 %v1038_v55, %v945_v50  ;;  %v1066_v62 = vmax.f32 %v1036_v42, 0.0 }
 0x31a   :  { %v1069_v61 = vmax.f32 %v1047_v53, 0.0 }
 0x31b   :  { %v1067_v63 = vmax.f32 %v1039_v58, 0.0 }
 0x31c   :  { %v1079_v0 = vpack.c.bf16 %v1069_v61, %v1068_v59 }
 0x31d   :  { %v1078_v2 = vpack.c.bf16 %v1067_v63, %v1066_v62  ;;  %v1459_v3 = vpop.f32.mrb[36].mxu0 }
 0x31e   :  { %v1060_v4 = vadd.f32 %v1459_v3, %v970_v1  ;;  %v1051_v5 = vpop.f32.mrb[37].mxu0 }
 0x31f   :  { %v1052_v8 = vadd.f32 %v1051_v5, %v960_v29  ;;  %v1460_v9 = vpop.f32.mrb[38].mxu0  ;;  %1461 = vmatprep.subr.bf16.mxu0 %v1078_v2 }
 0x320   :  { %v1063_v11 = vadd.f32 %v1460_v9, %v975_v6  ;;  %v1054_v12 = vpop.f32.mrb[39].mxu0  ;;  %1462 = vmatpush3.bf16.msra.mxu0 %v1078_v2  ;;  %v1072_v14 = vmax.f32 %v1060_v4, 0.0 }
 0x321   :  { %v1055_v22 = vadd.f32 %v1054_v12, %v965_v57  ;;  %1463 = vmatprep.subr.bf16.mxu0 %v1079_v0  ;;  %v1070_v23 = vmax.f32 %v1052_v8, 0.0 }
 0x322   :  { %v1073_v17 = vmax.f32 %v1063_v11, 0.0 }
 0x323   :  { %v1071_v19 = vmax.f32 %v1055_v22, 0.0 }
 0x324   :  { %v1081_v15 = vpack.c.bf16 %v1073_v17, %v1072_v14  ;;  %1464 = vmatpush3.bf16.msra.mxu0 %v1079_v0 }
 0x325   :  { %v1080_v16 = vpack.c.bf16 %v1071_v19, %v1070_v23 }
 0x327   :  { %1465 = vmatprep.subr.bf16.mxu0 %v1080_v16 }
 0x328   :  { %1466 = vmatpush3.bf16.msra.mxu0 %v1080_v16 }
 0x329   :  { %1467 = vmatprep.subr.bf16.mxu0 %v1081_v15 }
 0x32c   :  { %1468 = vmatpush3.bf16.msra.mxu0 %v1081_v15 }
 0x32d   :  { %1473 = vmatprep.subr.bf16.mxu0 %v1559_v21 }
 0x32f   :  { %1470 = vmatmul.mubr.msk.bf16.vlgmr.msra.gmra.mrb[40].mxu0 %vm1116_vm2, %v1533_v20 }
 0x330   :  { %1477 = vmatprep.mubr.msk.bf16.mxu0 %vm1560_vm3, %v1559_v21 }
 0x402   :  { %v1471_v26 = vpop.f32.mrb[40].mxu0 }
 0x403   :  { %v1166_v28 = vadd.f32 %v1471_v26, %v1099_v25  ;;  %v1157_v31 = vpop.f32.mrb[41].mxu0 }
 0x404   :  { %v1158_v60 = vadd.f32 %v1157_v31, %v1089_v24  ;;  %v1472_v27 = vpop.f32.mrb[42].mxu0 }
 0x405   :  { %v1169_v33 = vadd.f32 %v1472_v27, %v1104_v32  ;;  %v1160_v41 = vpop.f32.mrb[43].mxu0  ;;  %v1174_v54 = vmax.f32 %v1166_v28, 0.0 }
 0x406   :  { %v1161_v40 = vadd.f32 %v1160_v41, %v1094_v30  ;;  %v1172_v45 = vmax.f32 %v1158_v60, 0.0 }
 0x407   :  { %v1175_v43 = vmax.f32 %v1169_v33, 0.0 }
 0x408   :  { %v1173_v38 = vmax.f32 %v1161_v40, 0.0 }
 0x409   :  { %v1178_v46 = vpack.c.bf16 %v1175_v43, %v1174_v54 }
 0x40a   :  { %v1177_v34 = vpack.c.bf16 %v1173_v38, %v1172_v45 }
 0x40c   :  { %1474 = vmatpush3.bf16.msra.mxu0 %v1177_v34 }
 0x40d   :  { %1475 = vmatprep.subr.bf16.mxu0 %v1559_v21 }
 0x410   :  { %1476 = vmatpush3.bf16.msra.mxu0 %v1178_v46 }
 0x413   :  { %1478 = vmatmul.mubr.msk.bf16.vlgmr.msra.gmra.mrb[44].mxu0 %vm1185_vm4, %v1176_v36 }
 0x4e6   :  { %v1223_v44 = vpop.f32.mrb[44].mxu0 }
 0x4e7   :  { %v1224_v10 = vadd.f32 %v1223_v44, %v1183_v39  ;;  %v1479_v35 = vpop.f32.mrb[45].mxu0 }
 0x4e8   :  { %v1226_v47 = vpop.f32.mrb[46].mxu0 }
 0x4e9   :  { %1229 = vst [vmem:[#allocation2] sm:$0xff] %v1224_v10  ;;  %v1480_v48 = vpop.f32.mrb[47].mxu0 }
 0x4ea   :  { %1545 = shalt.err (!%p1542_p4)
}
 0x4eb   :  { %s1546_s21 = scalar_lea.hbm %s2038_s11, 128 }
 0x4ec   :  { %p1547_p5 = scmp.ne.s32.totalorder %s2038_s11, %s1546_s21  ;;  %p1550_p6 = scmp.lt.u32.totalorder %s1546_s21, %s2038_s11 }
 0x4ee   :  { %p1552_p7 = pnand %p1550_p6, %p1547_p5 }
 0x4f0   :  { %1555 = shalt.err (!%p1552_p7)
}
 0x4f1   :  { %1239 = dma.vmem_to_hbm [thread:$0]  %s1237_s2, 128, %s2038_s11, [#allocation3]  }
 0x4f2   :  { %1556 = dma.done.wait [#allocation3], 128  }
 0x4f3   :  { %1557 = vsyncadd [#allocation3], 4294967168 }
 0x4f4   :  { %1243 = vsyncpa [#allocation3], 1 }

</bundles_post_ra>
